<compile_context>
chip_gen: v7x
topology: tpu7x:2x2x1
jax: 0.10.0
libtpu: 0.0.40
codegen_flags: <defaults>
</compile_context>

<pallas_src>
import jax
import jax.numpy as jnp
from jax.experimental import pallas as pl
from jax.experimental.pallas import tpu as pltpu


# ------------------------- small helpers -------------------------

def _round_up(x, m):
    return ((x + m - 1) // m) * m


def _pad_axis(a, axis, new_size):
    pad = new_size - a.shape[axis]
    if pad == 0:
        return a
    cfg = [(0, 0)] * a.ndim
    cfg[axis] = (0, pad)
    return jnp.pad(a, cfg)


def _largest_tile(total, unit, cap):
    """Largest divisor of `total` that is a multiple of `unit` and <= cap (or None)."""
    if cap < unit or total % unit != 0:
        return None
    best = None
    for mult in range(1, cap // unit + 1):
        cand = unit * mult
        if total % cand == 0:
            best = cand
    return best


def _itemsize(dtype):
    return jnp.dtype(dtype).itemsize


def _vmem_limit_bytes():
    """Scoped-VMEM limit ~ half the physical VMEM: 32 MiB on v7x, 64 MiB on v5e/v6e."""
    try:
        cap = getattr(pltpu.get_tpu_info(), "vmem_capacity_bytes", None)
    except Exception:
        cap = None
    if not cap:
        cap = 64 * 1024 * 1024  # conservative fallback (v7x physical per-TC VMEM)
    return int(min(max(cap // 2, 32 * 1024 * 1024), 96 * 1024 * 1024))


# ------------------------- kernels -------------------------

def _linear_acc_kernel(x_ref, w_ref, b_ref, o_ref, acc_ref):
    """(tm, tk) @ (tk, tn), f32-accumulated over the last ("arbitrary") grid axis.

    The accumulator is seeded with the (broadcast) bias at k == 0, so the
    finalize step is a single unmasked full-tile store with no extra VALU add.
    """
    k = pl.program_id(2)

    @pl.when(k == 0)
    def _init():
        acc_ref[...] = jnp.broadcast_to(
            b_ref[...].astype(jnp.float32), acc_ref.shape)

    acc_ref[...] += jnp.dot(x_ref[...], w_ref[...],
                            preferred_element_type=jnp.float32)

    @pl.when(k == pl.num_programs(2) - 1)
    def _finalize():
        o_ref[...] = acc_ref[...].astype(o_ref.dtype)


def _linear_simple_kernel(x_ref, w_ref, b_ref, o_ref):
    """Single-shot (bs, nf) @ (nf, tn) + b (fallback for small / unaligned nf)."""
    o_ref[...] = (
        jnp.dot(x_ref[...], w_ref[...], preferred_element_type=jnp.float32)
        + b_ref[...].astype(jnp.float32)
    ).astype(o_ref.dtype)


# ------------------------- wrappers -------------------------

def flatten_head_shared(x, w, b):
    """individual=False: one Linear shared across variables.

    x: (bs, n_vars, d_model, patch_num), w: (nf, tw), b: (tw,)
    """
    bs, n_vars, d_model, patch_num = x.shape
    nf = d_model * patch_num
    tw = w.shape[1]
    assert w.shape == (nf, tw) and b.shape == (tw,)

    M, K, N = bs * n_vars, nf, tw
    x_item, w_item, o_item = _itemsize(x.dtype), _itemsize(w.dtype), _itemsize(x.dtype)

    vmem_limit = _vmem_limit_bytes()
    budget = int(0.8 * vmem_limit)

    # Lane-dense N: pad only the (small) weights/bias to x128 -> unmasked stores.
    N_p = _round_up(N, 128)
    tn = 256 if N_p % 256 == 0 else 128
    nt = N_p // tn

    # tm / tk must DIVIDE the true M / K (no padded copy of x), be 8/128-aligned
    # (or full-extent), and the double-buffered working set must fit the budget.
    tm_cands = sorted({t for t in (_largest_tile(M, 8, c)
                                   for c in (512, 256, 128, 64, 32, 16, 8)) if t},
                      reverse=True) or [M]
    tk_cands = sorted({t for t in (_largest_tile(K, 128, c)
                                   for c in (2048, 1024, 512, 256, 128)) if t},
                      reverse=True) or [K]

    def _est(tm_c, tk_c):
        return (2 * tm_c * tk_c * x_item + 2 * tk_c * tn * w_item + 2 * tn * w_item
                + tm_c * tn * 4 + 2 * tm_c * tn * o_item)

    tm, tk = tm_cands[-1], tk_cands[-1]
    done = False
    for tm_c in tm_cands:            # big tm first: weight re-streaming ~ 1/tm
        for tk_c in tk_cands:        # then big tk: fewer, larger DMAs
            if _est(tm_c, tk_c) <= budget:
                tm, tk, done = tm_c, tk_c, True
                break
        if done:
            break
    # TODO(synk): a pathological huge K that is not a multiple of 128 would still
    # need a padded x copy; real PITS configs have nf = d_model*patch_num % 128 == 0.

    mt, kt = M // tm, K // tk

    # v7x megacore: ensure at least one "parallel" axis has >= 2 steps.
    if nt == 1 and mt < 2 and M % 16 == 0:
        half = _largest_tile(M, 8, M // 2)
        if half is not None:
            tm = half
            mt = M // tm

    x_flat = x.reshape(M, K)                      # free view of contiguous data
    w_p = _pad_axis(w, 1, N_p)                    # (K, N_p)
    b_p = _pad_axis(b.reshape(1, N), 1, N_p)      # (1, N_p)

    cost = pl.CostEstimate(
        flops=2 * M * K * N,
        transcendentals=0,
        bytes_accessed=int(nt * M * K * x_item       # x re-streamed per N tile
                           + mt * K * N_p * w_item   # W re-streamed per M tile
                           + M * N_p * o_item),
    )

    out = pl.pallas_call(
        _linear_acc_kernel,
        out_shape=jax.ShapeDtypeStruct((M, N_p), x.dtype),
        grid_spec=pltpu.PrefetchScalarGridSpec(
            num_scalar_prefetch=0,
            grid=(mt, nt, kt),
            in_specs=[
                pl.BlockSpec((tm, tk), lambda i, j, k: (i, k)),
                pl.BlockSpec((tk, tn), lambda i, j, k: (k, j)),
                pl.BlockSpec((1, tn), lambda i, j, k: (0, j)),
            ],
            out_specs=pl.BlockSpec((tm, tn), lambda i, j, k: (i, j)),
            scratch_shapes=[pltpu.VMEM((tm, tn), jnp.float32)],
        ),
        compiler_params=pltpu.CompilerParams(
            dimension_semantics=("parallel", "parallel", "arbitrary"),
            vmem_limit_bytes=vmem_limit,
        ),
        cost_estimate=cost,
    )(x_flat, w_p, b_p)

    return out[:, :N].reshape(bs, n_vars, tw)


def flatten_head_individual(x, w, b):
    """individual=True: one Linear per variable.

    x: (bs, n_vars, d_model, patch_num), w: (n_vars, nf, tw), b: (n_vars, tw)
    """
    bs, n_vars, d_model, patch_num = x.shape
    nf = d_model * patch_num
    tw = w.shape[-1]
    assert w.shape == (n_vars, nf, tw) and b.shape == (n_vars, tw)

    x_item, w_item, o_item = _itemsize(x.dtype), _itemsize(w.dtype), _itemsize(x.dtype)
    vmem_limit = _vmem_limit_bytes()
    budget = int(0.8 * min(vmem_limit, 32 * 1024 * 1024))   # v7x-safe guard

    N_p = _round_up(tw, 128)
    tn = 256 if N_p % 256 == 0 else 128
    nt = N_p // tn

    w_p = _pad_axis(w, 2, N_p)                          # (n_vars, nf, N_p)
    b_p = _pad_axis(b, 1, N_p).reshape(n_vars, 1, N_p)  # (n_vars, 1, N_p)

    cost = pl.CostEstimate(
        flops=2 * bs * n_vars * nf * tw,
        transcendentals=0,
        bytes_accessed=int(nt * bs * n_vars * nf * x_item
                           + n_vars * nf * N_p * w_item
                           + bs * n_vars * N_p * o_item),
    )

    if nf % 128 == 0:
        # Fast path: x stays in its natural layout -- a flat (bs, n_vars*nf) view
        # (free reshape of contiguous data, NO transpose / extra HBM pass).  The
        # reduction over nf is tiled so the weight slab fits v7x VMEM; the weight
        # stream gets 3-deep buffering when the budget allows.
        def _est(tk_c, bufs):
            return (bufs * tk_c * tn * w_item + 2 * bs * tk_c * x_item
                    + 2 * tn * w_item + bs * tn * 4 + 2 * bs * tn * o_item)

        tk_i, w_bufs = None, 2
        for bufs in (3, 2):
            for cap in (2048, 1024, 512, 256, 128):
                cand = _largest_tile(nf, 128, cap)
                if cand is not None and _est(cand, bufs) <= budget:
                    tk_i, w_bufs = cand, bufs
                    break
            if tk_i is not None:
                break
        if tk_i is None:
            tk_i, w_bufs = 128, 2    # best effort
        kt = nf // tk_i

        x_flat = x.reshape(bs, n_vars * nf)   # free view; columns of var i, chunk k
                                              # live at block index i*kt + k

        out = pl.pallas_call(
            _linear_acc_kernel,
            out_shape=jax.ShapeDtypeStruct((bs, n_vars * N_p), x.dtype),
            grid_spec=pltpu.PrefetchScalarGridSpec(
                num_scalar_prefetch=0,
                grid=(n_vars, nt, kt),
                in_specs=[
                    pl.BlockSpec((bs, tk_i), lambda i, j, k: (0, i * kt + k)),
                    pl.BlockSpec((pl.Squeezed(), tk_i, tn),
                                 lambda i, j, k: (i, k, j),
                                 pipeline_mode=pl.Buffered(w_bufs)),
                    pl.BlockSpec((pl.Squeezed(), 1, tn), lambda i, j, k: (i, 0, j)),
                ],
                out_specs=pl.BlockSpec((bs, tn), lambda i, j, k: (0, i * nt + j)),
                scratch_shapes=[pltpu.VMEM((bs, tn), jnp.float32)],
            ),
            compiler_params=pltpu.CompilerParams(
                dimension_semantics=("parallel", "parallel", "arbitrary"),
                vmem_limit_bytes=vmem_limit,
            ),
            cost_estimate=cost,
        )(x_flat, w_p, b_p)
    else:
        # Fallback (nf not 128-aligned, typically small): a (n_vars, bs, nf) layout is
        # required so the full-extent (bs, nf) block is exempt from the (8,128) rule.
        # TODO(synk): this transpose disappears if the surrounding model keeps
        # activations as (n_vars, bs, ...).
        x_v = x.reshape(bs, n_vars, nf).transpose(1, 0, 2)   # (n_vars, bs, nf)

        out = pl.pallas_call(
            _linear_simple_kernel,
            out_shape=jax.ShapeDtypeStruct((bs, n_vars * N_p), x.dtype),
            grid_spec=pltpu.PrefetchScalarGridSpec(
                num_scalar_prefetch=0,
                grid=(n_vars, nt),
                in_specs=[
                    pl.BlockSpec((pl.Squeezed(), bs, nf), lambda i, j: (i, 0, 0)),
                    pl.BlockSpec((pl.Squeezed(), nf, tn), lambda i, j: (i, 0, j)),
                    pl.BlockSpec((pl.Squeezed(), 1, tn), lambda i, j: (i, 0, j)),
                ],
                out_specs=pl.BlockSpec((bs, tn), lambda i, j: (0, i * nt + j)),
            ),
            compiler_params=pltpu.CompilerParams(
                dimension_semantics=("parallel", "parallel"),
                vmem_limit_bytes=vmem_limit,
            ),
            cost_estimate=cost,
        )(x_v, w_p, b_p)

    return out.reshape(bs, n_vars, N_p)[:, :, :tw]


# ------------------------- demo / check -------------------------

if __name__ == "__main__":

    def run_case(bs, n_vars, d_model, patch_num, target_window, key):
        nf = d_model * patch_num
        k_x, k_ws, k_bs, k_wi, k_bi = jax.random.split(key, 5)
        x = jax.random.normal(k_x, (bs, n_vars, d_model, patch_num), dtype=jnp.float32)
        w_shared = jax.random.normal(k_ws, (nf, target_window), dtype=jnp.float32) * 0.05
        b_shared = jax.random.normal(k_bs, (target_window,), dtype=jnp.float32) * 0.05
        w_indiv = jax.random.normal(k_wi, (n_vars, nf, target_window), dtype=jnp.float32) * 0.05
        b_indiv = jax.random.normal(k_bi, (n_vars, target_window), dtype=jnp.float32) * 0.05

        y_shared = jax.block_until_ready(flatten_head_shared(x, w_shared, b_shared))
        y_indiv = jax.block_until_ready(flatten_head_individual(x, w_indiv, b_indiv))

        # Pure-JAX references (Flatten(start_dim=-2) == reshape to (bs, n_vars, nf)).
        x_flat = x.reshape(bs, n_vars, nf)
        hp = jax.lax.Precision.HIGHEST
        ref_shared = jnp.einsum("bvf,ft->bvt", x_flat, w_shared, precision=hp) + b_shared
        ref_indiv = (jnp.einsum("bvf,vft->bvt", x_flat, w_indiv, precision=hp)
                     + b_indiv[None, :, :])

        assert y_shared.shape == (bs, n_vars, target_window)
        assert y_indiv.shape == (bs, n_vars, target_window)
        assert jnp.allclose(y_shared, ref_shared, atol=5e-3, rtol=5e-3), (
            "shared max err", float(jnp.max(jnp.abs(y_shared - ref_shared))))
        assert jnp.allclose(y_indiv, ref_indiv, atol=5e-3, rtol=5e-3), (
            "indiv max err", float(jnp.max(jnp.abs(y_indiv - ref_indiv))))

    # head_dropout = 0 -> dropout is the identity; nothing to implement.
    # TODO(synk): non-zero head_dropout (training mode) would need pltpu.prng_* masking.
    key = jax.random.PRNGKey(0)
    k0, k1 = jax.random.split(key)
    # Case A: small / unaligned nf (exercises the fallback individual path).
    run_case(bs=2, n_vars=4, d_model=8, patch_num=4, target_window=16, key=k0)
    # Case B: 128-aligned nf (exercises the transpose-free, K-tiled fast path + Buffered weights).
    run_case(bs=2, n_vars=4, d_model=16, patch_num=8, target_window=24, key=k1)

    print("KERNEL_OK")
</pallas_src>

<mosaic_0001>
module attributes {stable_mosaic.version = 11 : i64} {
  func.func @_linear_acc_kernel(%arg0: i32, %arg1: i32, %arg2: i32, %arg3: memref<8x32xf32, #tpu.memory_space<vmem>>, %arg4: memref<32x128xf32, #tpu.memory_space<vmem>>, %arg5: memref<1x128xf32, #tpu.memory_space<vmem>>, %arg6: memref<8x128xf32, #tpu.memory_space<vmem>>, %arg7: memref<8x128xf32, #tpu.memory_space<vmem>>) attributes {dimension_semantics = [#tpu.dimension_semantics<parallel>, #tpu.dimension_semantics<parallel>, #tpu.dimension_semantics<arbitrary>], iteration_bounds = array<i64: 1, 1, 1>, scalar_prefetch = 0 : i64, scratch_operands = 1 : i64, tpu.core_type = #tpu.core_type<tc>, window_params = [{transform_indices = @transform_0, window_bounds = array<i64: 8, 32>}, {transform_indices = @transform_1, window_bounds = array<i64: 32, 128>}, {transform_indices = @transform_2, window_bounds = array<i64: 1, 128>}, {transform_indices = @transform_3, window_bounds = array<i64: 8, 128>}]} {
    %c0_i32 = arith.constant 0 : i32
    %0 = arith.cmpi eq, %arg2, %c0_i32 : i32
    %1 = arith.extui %0 : i1 to i32
    %c0_i32_0 = arith.constant 0 : i32
    %2 = arith.cmpi ne, %1, %c0_i32_0 : i32
    scf.if %2 {
      %c0_10 = arith.constant 0 : index
      %c0_11 = arith.constant 0 : index
      %12 = vector.load %arg5[%c0_10, %c0_11] : memref<1x128xf32, #tpu.memory_space<vmem>>, vector<1x128xf32>
      %13 = vector.shape_cast %12 : vector<1x128xf32> to vector<1x128xf32>
      %14 = vector.broadcast %13 : vector<1x128xf32> to vector<8x128xf32>
      %c0_12 = arith.constant 0 : index
      %c0_13 = arith.constant 0 : index
      %15 = vector.load %arg7[%c0_12, %c0_13] : memref<8x128xf32, #tpu.memory_space<vmem>>, vector<8x128xf32>
      tpu.vector_store %arg7[%c0_12, %c0_13], %14 {strides = array<i32>} : memref<8x128xf32, #tpu.memory_space<vmem>>, vector<8x128xf32>,
    } else {
    }
    %c0 = arith.constant 0 : index
    %c0_1 = arith.constant 0 : index
    %3 = vector.load %arg7[%c0, %c0_1] : memref<8x128xf32, #tpu.memory_space<vmem>>, vector<8x128xf32>
    %c0_2 = arith.constant 0 : index
    %c0_3 = arith.constant 0 : index
    %4 = vector.load %arg3[%c0_2, %c0_3] : memref<8x32xf32, #tpu.memory_space<vmem>>, vector<8x32xf32>
    %c0_4 = arith.constant 0 : index
    %c0_5 = arith.constant 0 : index
    %5 = vector.load %arg4[%c0_4, %c0_5] : memref<32x128xf32, #tpu.memory_space<vmem>>, vector<32x128xf32>
    %cst = arith.constant dense<0.000000e+00> : vector<8x128xf32>
    %6 = tpu.matmul %4, %5, %cst {dimension_numbers = #tpu.dot_dimension_numbers<[1], [0], [0], [1], [0, 0, 1, 1], [], []>} : vector<8x32xf32>, vector<32x128xf32>, vector<8x128xf32> -> vector<8x128xf32>
    %7 = arith.addf %3, %6 : vector<8x128xf32>
    %c0_6 = arith.constant 0 : index
    %c0_7 = arith.constant 0 : index
    %8 = vector.load %arg7[%c0_6, %c0_7] : memref<8x128xf32, #tpu.memory_space<vmem>>, vector<8x128xf32>
    tpu.vector_store %arg7[%c0_6, %c0_7], %7 {strides = array<i32>} : memref<8x128xf32, #tpu.memory_space<vmem>>, vector<8x128xf32>,
    %c0_i32_8 = arith.constant 0 : i32
    %9 = arith.cmpi eq, %arg2, %c0_i32_8 : i32
    %10 = arith.extui %9 : i1 to i32
    %c0_i32_9 = arith.constant 0 : i32
    %11 = arith.cmpi ne, %10, %c0_i32_9 : i32
    scf.if %11 {
      %c0_10 = arith.constant 0 : index
      %c0_11 = arith.constant 0 : index
      %12 = vector.load %arg7[%c0_10, %c0_11] : memref<8x128xf32, #tpu.memory_space<vmem>>, vector<8x128xf32>
      %c0_12 = arith.constant 0 : index
      %c0_13 = arith.constant 0 : index
      %13 = vector.load %arg6[%c0_12, %c0_13] : memref<8x128xf32, #tpu.memory_space<vmem>>, vector<8x128xf32>
      tpu.vector_store %arg6[%c0_12, %c0_13], %12 {strides = array<i32>} : memref<8x128xf32, #tpu.memory_space<vmem>>, vector<8x128xf32>,
    } else {
    }
    return
  }
  func.func @transform_0(%arg0: i32, %arg1: i32, %arg2: i32) -> (i32, i32) {
    %c0_i32 = arith.constant 0 : i32
    return %arg0, %arg2 : i32, i32
  }
  func.func @transform_1(%arg0: i32, %arg1: i32, %arg2: i32) -> (i32, i32) {
    %c0_i32 = arith.constant 0 : i32
    return %arg2, %arg1 : i32, i32
  }
  func.func @transform_2(%arg0: i32, %arg1: i32, %arg2: i32) -> (i32, i32) {
    %c0_i32 = arith.constant 0 : i32
    %c0_i32_0 = arith.constant 0 : i32
    return %c0_i32, %arg1 : i32, i32
  }
  func.func @transform_3(%arg0: i32, %arg1: i32, %arg2: i32) -> (i32, i32) {
    %c0_i32 = arith.constant 0 : i32
    return %arg0, %arg1 : i32, i32
  }
}

</mosaic_0001>

<bundles_post_ra>
// kernel: tpu_custom_call.1
= control target key start
LH: loop header
LB: loop body
LE: loop exit
PB: predicated region body
PF: predicated region fallthrough
CT: control target
= control target key end

     0   :  { %8 = vsyncpa [#allocation4], 0  ;;  %s334_s0 = inlined_call_operand.hbm [shape: f32[8,32], index: 0, kind: input, shape index: {}]   ;;  %s335_s1 = inlined_call_operand.hbm [shape: f32[32,128], index: 1, kind: input, shape index: {}]   ;;  %s336_s2 = inlined_call_operand.vmem [shape: f32[1,128], index: 2, kind: input, shape index: {}]   ;;  %s337_s3 = inlined_call_operand.hbm [shape: f32[8,128], index: 3, kind: output, shape index: {}]  }
   0x1   :  { %9 = vsyncpa [#allocation7], 0 }
   0x2   :  { %10 = vsyncpa [#allocation5], 0  ;;  %s260_s12 = smov [#allocation3]   ;;  %s261_s14 = smov [#allocation6]  }
   0x3   :  { %s17_s13 = sshll.u32 %s260_s12, 4  ;;  %s26_s15 = sshll.u32 %s261_s14, 4  ;;  %s18_s13 = int_to_ptr.vmem [resolvable:$true] %s17_s13  ;;  %s288_s15 = int_to_ptr.vmem [resolvable:$true] %s26_s15 }
   0x4   :  { %s188_s18 = scalar_lea.hbm %s334_s0, 128 }
   0x5   :  { %p189_p0 = scmp.ne.s32.totalorder %s334_s0, %s188_s18  ;;  %p192_p1 = scmp.lt.u32.totalorder %s188_s18, %s334_s0 }
   0x7   :  { %p194_p2 = pnand %p192_p1, %p189_p0 }
   0x9   :  { %197 = shalt.err (!%p194_p2)
}
   0xa   :  { %s198_s23 = scalar_lea.vmem %s18_s13, 128  ;;  %p203_p4 = scmp.lt.s32.totalorder %s18_s13, %s18_s13 }
   0xb   :  { %p199_p3 = scmp.ne.s32.totalorder %s18_s13, %s198_s23  ;;  %p204_p5 = scmp.lt.s32.totalorder %s198_s23, %s198_s23 }
   0xd   :  { %p205_p6 = por %p204_p5, %p203_p4 }
   0xf   :  { %p206_p7 = pnand %p205_p6, %p199_p3 }
  0x11   :  { %209 = shalt.err (!%p206_p7)
}
  0x12   :  { %20 = dma.hbm_to_vmem [thread:$0]  %s334_s0, 128, %s18_s13, [#allocation4]  }
  0x13   :  { %s210_s28 = scalar_lea.hbm %s335_s1, 512 }
  0x14   :  { %p211_p8 = scmp.ne.s32.totalorder %s335_s1, %s210_s28  ;;  %p214_p9 = scmp.lt.u32.totalorder %s210_s28, %s335_s1 }
  0x16   :  { %p216_p10 = pnand %p214_p9, %p211_p8 }
  0x18   :  { %219 = shalt.err (!%p216_p10)
}
  0x19   :  { %s220_s6 = scalar_lea.vmem %s288_s15, 512  ;;  %p225_p12 = scmp.lt.s32.totalorder %s288_s15, %s288_s15 }
  0x1a   :  { %p221_p11 = scmp.ne.s32.totalorder %s288_s15, %s220_s6  ;;  %p226_p13 = scmp.lt.s32.totalorder %s220_s6, %s220_s6 }
  0x1c   :  { %p227_p0 = por %p226_p13, %p225_p12 }
  0x1e   :  { %p228_p1 = pnand %p227_p0, %p221_p11 }
  0x20   :  { %231 = shalt.err (!%p228_p1)
}
  0x21   :  { %s262_s0 = smov 128   ;;  %s263_s7 = smov 8  }
  0x22   :  { %32 = dma.hbm_to_vmem [thread:$0]  %s335_s1, 512, %s288_s15, [#allocation7], %s262_s0, %s262_s0, %s263_s7  }
  0x23   :  { %254 = dma.done.wait [#allocation4], 128  }
  0x24   :  { %255 = vsyncadd [#allocation4], 4294967168 }
  0x25   :  { %256 = dma.done.wait [#allocation7], 512  }
  0x26   :  { %257 = vsyncadd [#allocation7], 4294966784  ;;  %v264_v0 = vmov 0.0|0.0   ;;  %vm265_vm0 = vmmov 0   ;;  %v266_v1 = vmov 0.0   ;;  %v55_v2 = vld [vmem:[#allocation6] sm:$0xff] }
  0x27   :  { %174 = vmatprep.subr.bf16.mxu0 %v264_v0  ;;  %171 = vmatprep.mubr.msk.f32.mxu0 %vm265_vm0, %v266_v1  ;;  %v56_v3 = vld [vmem:[#allocation6 + $0x8] sm:$0xff]  ;;  %v57_v4 = vld [vmem:[#allocation6 + $0x10] sm:$0xff]  ;;  %v58_v6 = vld [vmem:[#allocation6 + $0x18] sm:$0xff]  ;;  %vm59_vm1 = vcmask 261120   ;;  %s267_s11 = smov [#allocation8]  }
  0x28   :  { %v175_v5 = vpack.c.bf16 %v56_v3, %v55_v2  ;;  %v178_v7 = vpack.c.bf16 %v58_v6, %v57_v4  ;;  %v54_v8 = vld [vmem:[#allocation3] sm:$0xff]  ;;  %s146_s12 = sshll.u32 %s267_s11, 4  ;;  %s147_s12 = int_to_ptr.vmem [resolvable:$true] %s146_s12 }
  0x29   :  { %v156_v9 = vld [vmem:[%s336_s2] ss:$0 sm:$0xff]  ;;  %s232_s13 = scalar_lea.vmem %s147_s12, 128  ;;  %p237_p3 = scmp.lt.s32.totalorder %s147_s12, %s147_s12 }
  0x2a   :  { %176 = vmatpush3.bf16.msra.mxu0 %v175_v5  ;;  %p233_p2 = scmp.ne.s32.totalorder %s147_s12, %s232_s13  ;;  %p238_p4 = scmp.lt.s32.totalorder %s232_s13, %s232_s13 }
  0x2b   :  { %177 = vmatprep.subr.bf16.mxu0 %v264_v0 }
  0x2c   :  { %p239_p5 = por %p238_p4, %p237_p3 }
  0x2e   :  { %179 = vmatpush3.bf16.msra.mxu0 %v178_v7  ;;  %p240_p6 = pnand %p239_p5, %p233_p2 }
  0x31   :  { %172 = vmatmul.mubr.msk.f32.vlgmr.msra.gmra.mrb[0].mxu0 %vm59_vm1, %v54_v8 }
 0x104   :  { %v129_v10 = vpop.f32.mrb[0].mxu0 }
 0x105   :  { %v133_v11 = vadd.f32 %v156_v9, %v129_v10  ;;  %v173_v12 = vpop.f32.mrb[1].mxu0 }
 0x107   :  { %139 = vst [vmem:[#allocation8] sm:$0xff] %v133_v11 }
 0x108   :  { %243 = shalt.err (!%p240_p6)
}
 0x109   :  { %s244_s16 = scalar_lea.hbm %s337_s3, 128 }
 0x10a   :  { %p245_p7 = scmp.ne.s32.totalorder %s337_s3, %s244_s16  ;;  %p248_p8 = scmp.lt.u32.totalorder %s244_s16, %s337_s3 }
 0x10c   :  { %p250_p9 = pnand %p248_p8, %p245_p7 }
 0x10e   :  { %253 = shalt.err (!%p250_p9)
}
 0x10f   :  { %149 = dma.vmem_to_hbm [thread:$0]  %s147_s12, 128, %s337_s3, [#allocation5]  }
 0x110   :  { %258 = dma.done.wait [#allocation5], 128  }
 0x111   :  { %259 = vsyncadd [#allocation5], 4294967168 }
 0x112   :  { %153 = vsyncpa [#allocation4], 1 }
 0x113   :  { %154 = vsyncpa [#allocation7], 1 }
 0x114   :  { %155 = vsyncpa [#allocation5], 1 }

</bundles_post_ra>
